<compile_context>
chip_gen: v7x
topology: tpu7x:2x2x1
jax: 0.10.0
libtpu: 0.0.40
codegen_flags: <defaults>
</compile_context>

<pallas_src>
import functools
import re

import jax
import jax.numpy as jnp
from jax.experimental import pallas as pl
from jax.experimental.pallas import tpu as pltpu


def _sigmoid_kernel(x_ref, o_ref, *, compute_dtype):
    # Elementwise sigmoid on one VMEM tile.
    x = x_ref[...].astype(compute_dtype)
    half = jnp.asarray(0.5, compute_dtype)
    one = jnp.asarray(1.0, compute_dtype)
    o_ref[...] = (half * (jnp.tanh(half * x) + one)).astype(o_ref.dtype)


def _round_up(a: int, m: int) -> int:
    return ((a + m - 1) // m) * m


def _tpu_generation() -> int:
    """Best-effort TPU generation from device_kind; 0 if unknown."""
    try:
        kind = jax.devices()[0].device_kind
    except Exception:  # pragma: no cover - defensive
        return 0
    m = re.search(r"(\d+)", kind)
    return int(m.group(1)) if m else 0


def _gen_tuning(gen: int):
    """(target_tile_bytes, vmem_limit_bytes) per TPU generation."""
    if gen >= 7:
        # v7x: ~3.2 TB/s HBM, 64 MiB physical VMEM, 32 MiB scoped default.
        return 8 << 20, 48 << 20
    if gen == 6:
        # v6e: 4 MiB tiles keep the 4-buffer footprint at 16 MiB (< 32 default).
        return 4 << 20, None
    # v5e (16 MiB scoped default) and unknown chips: stay conservative.
    return 2 << 20, None


def _choose_lanes(n: int, cap: int = 2048):
    """Largest lane width (multiple of 128, <= cap) dividing n; else `cap`-ish."""
    for lanes in range(cap, 0, -128):
        if n % lanes == 0:
            return lanes
    # No exact divisor (e.g. odd n): widest lane width, tiny (< lanes) tail pad.
    return min(cap, 128 * pl.cdiv(n, 128))


def sigmoid_pallas(x: jax.Array, *, min_pallas_elems: int = 1024) -> jax.Array:
    """Elementwise sigmoid matching torch.sigmoid semantics."""
    orig_shape = x.shape
    orig_dtype = x.dtype

    # torch.sigmoid promotes integer / bool inputs to floating point.
    if not jnp.issubdtype(orig_dtype, jnp.floating):
        x = x.astype(jnp.float32)
    dtype = x.dtype
    n = x.size

    # Tiny inputs: a pallas_call launch is slower than the fused XLA op.
    if n == 0 or n < min_pallas_elems:
        return jax.nn.sigmoid(x)

    gen = _tpu_generation()
    target_tile_bytes, vmem_limit_bytes = _gen_tuning(gen)

    itemsize = jnp.dtype(dtype).itemsize
    # dtype-aware minimal sublane multiple (f32: 8, bf16/f16: 16, fp8: 32).
    sub = {1: 32, 2: 16, 4: 8}.get(itemsize, 8)

    lanes = _choose_lanes(n)
    padded_n = _round_up(n, lanes)          # pad amount is < lanes (often 0)
    rows = padded_n // lanes

    # Tile rows: ~target_tile_bytes per block, multiple of the sublane tile.
    row_bytes = lanes * itemsize
    tile_r = max(sub, (target_tile_bytes // row_bytes) // sub * sub)
    # v7x megacore: guarantee >= 2 row blocks whenever the tensor can split,
    # so the "parallel" axis really shards across both TensorCores.
    if gen >= 7 and rows >= 2 * sub:
        tile_r = min(tile_r, _round_up(pl.cdiv(rows, 2), sub))
    if tile_r >= rows:
        tile_r = rows                       # single block == full array extent
    grid_r = pl.cdiv(rows, tile_r)          # Pallas masks the partial last block

    xf = x.reshape(-1)
    if padded_n != n:
        # Ragged tail only: pad by < lanes elements (review option (a)); the
        # exact-divisor path above (common case) needs no pad and no slice.
        xf = jnp.pad(xf, (0, padded_n - n))
    x2 = xf.reshape(rows, lanes)

    # bf16 math only where the VPU/EUP are bf16-capable (v6e / v7x); v5e and
    # unknown chips compute in f32.
    compute_dtype = dtype if (dtype == jnp.bfloat16 and gen >= 6) else jnp.float32

    out2 = pl.pallas_call(
        functools.partial(_sigmoid_kernel, compute_dtype=compute_dtype),
        out_shape=jax.ShapeDtypeStruct((rows, lanes), dtype),
        grid_spec=pltpu.PrefetchScalarGridSpec(
            num_scalar_prefetch=0,
            grid=(grid_r,),
            in_specs=[pl.BlockSpec((tile_r, lanes), lambda i: (i, 0))],
            out_specs=pl.BlockSpec((tile_r, lanes), lambda i: (i, 0)),
        ),
        compiler_params=pltpu.CompilerParams(
            dimension_semantics=("parallel",),   # v7x: shard rows over 2 TCs
            vmem_limit_bytes=vmem_limit_bytes,
        ),
    )(x2)

    out_flat = out2.reshape(-1)
    if padded_n != n:
        out_flat = out_flat[:n]
    return out_flat.reshape(orig_shape)


class Sigmoid:
    """JAX/Pallas equivalent of the PyTorch `Sigmoid` module (no parameters)."""

    def __init__(self) -> None:
        self.training = True

    def __call__(self, x: jax.Array) -> jax.Array:
        return self.forward(x)

    def forward(self, x: jax.Array) -> jax.Array:
        return sigmoid_pallas(x)


if __name__ == "__main__":
    k1, k2, k3 = jax.random.split(jax.random.PRNGKey(0), 3)
    mod = Sigmoid()

    # Primary check: small NCHW input (batch=2, channels=4, spatial=16x16).
    # 2048 f32 elements -> zero-copy (1, 2048) lane-dense slab, no pad/slice.
    x = jax.random.normal(k1, (2, 4, 16, 16), dtype=jnp.float32)
    y = jax.block_until_ready(mod(x))
    ref = jax.nn.sigmoid(x)
    assert y.shape == x.shape and y.dtype == x.dtype
    assert jnp.allclose(y, ref, atol=1e-6, rtol=1e-5)

    # Ragged-shape check: odd size exercises the tiny (<lanes) tail pad/slice
    # path with a Pallas-masked partial row block.
    x_odd = jax.random.normal(k2, (3, 5, 17, 31), dtype=jnp.float32)
    y_odd = jax.block_until_ready(mod(x_odd))
    ref_odd = jax.nn.sigmoid(x_odd)
    assert y_odd.shape == x_odd.shape and y_odd.dtype == x_odd.dtype
    assert jnp.allclose(y_odd, ref_odd, atol=1e-6, rtol=1e-5)

    # bf16 check (dtype-aware tolerance; bf16 compute on v6e/v7x, f32 on v5e).
    x_bf = jax.random.normal(k3, (4, 8, 32, 32), dtype=jnp.bfloat16)
    y_bf = jax.block_until_ready(mod(x_bf))
    ref_bf = jax.nn.sigmoid(x_bf)
    assert y_bf.shape == x_bf.shape and y_bf.dtype == x_bf.dtype
    assert jnp.allclose(y_bf.astype(jnp.float32), ref_bf.astype(jnp.float32),
                        atol=2e-2, rtol=2e-2)

    # Integer-input check: promoted to float32 (torch.sigmoid promotes ints).
    x_int = (jax.random.normal(k1, (2, 4, 16, 16)) * 4.0).astype(jnp.int32)
    y_int = jax.block_until_ready(mod(x_int))
    ref_int = jax.nn.sigmoid(x_int.astype(jnp.float32))
    assert y_int.dtype == jnp.float32 and y_int.shape == x_int.shape
    assert jnp.allclose(y_int, ref_int, atol=1e-6, rtol=1e-5)

    print("KERNEL_OK")
</pallas_src>

<mosaic_0001>
module attributes {stable_mosaic.version = 11 : i64} {
  func.func @_sigmoid_kernel(%arg0: i32, %arg1: memref<1x2048xf32, #tpu.memory_space<vmem>>, %arg2: memref<1x2048xf32, #tpu.memory_space<vmem>>) attributes {dimension_semantics = [#tpu.dimension_semantics<parallel>], iteration_bounds = array<i64: 1>, scalar_prefetch = 0 : i64, scratch_operands = 0 : i64, tpu.core_type = #tpu.core_type<tc>, window_params = [{transform_indices = @transform_0, window_bounds = array<i64: 1, 2048>}, {transform_indices = @transform_1, window_bounds = array<i64: 1, 2048>}]} {
    %c0 = arith.constant 0 : index
    %c0_0 = arith.constant 0 : index
    %0 = vector.load %arg1[%c0, %c0_0] : memref<1x2048xf32, #tpu.memory_space<vmem>>, vector<1x2048xf32>
    %cst = arith.constant 5.000000e-01 : f32
    %1 = vector.broadcast %cst : f32 to vector<1x2048xf32>
    %2 = arith.mulf %1, %0 : vector<1x2048xf32>
    %3 = math.tanh %2 : vector<1x2048xf32>
    %cst_1 = arith.constant 1.000000e+00 : f32
    %4 = vector.broadcast %cst_1 : f32 to vector<1x2048xf32>
    %5 = arith.addf %3, %4 : vector<1x2048xf32>
    %cst_2 = arith.constant 5.000000e-01 : f32
    %6 = vector.broadcast %cst_2 : f32 to vector<1x2048xf32>
    %7 = arith.mulf %6, %5 : vector<1x2048xf32>
    %c0_3 = arith.constant 0 : index
    %c0_4 = arith.constant 0 : index
    %8 = vector.load %arg2[%c0_3, %c0_4] : memref<1x2048xf32, #tpu.memory_space<vmem>>, vector<1x2048xf32>
    tpu.vector_store %arg2[%c0_3, %c0_4], %7 {strides = array<i32>} : memref<1x2048xf32, #tpu.memory_space<vmem>>, vector<1x2048xf32>,
    return
  }
  func.func @transform_0(%arg0: i32) -> (i32, i32) {
    %c0_i32 = arith.constant 0 : i32
    %c0_i32_0 = arith.constant 0 : i32
    return %arg0, %c0_i32 : i32, i32
  }
  func.func @transform_1(%arg0: i32) -> (i32, i32) {
    %c0_i32 = arith.constant 0 : i32
    %c0_i32_0 = arith.constant 0 : i32
    return %arg0, %c0_i32 : i32, i32
  }
}

</mosaic_0001>

<bundles_post_ra>
// kernel: tpu_custom_call.1
= control target key start
LH: loop header
LB: loop body
LE: loop exit
PB: predicated region body
PF: predicated region fallthrough
CT: control target
= control target key end

     0   :  { %6 = vsyncpa [#allocation3], 0  ;;  %s138_s0 = inlined_call_operand.hbm [shape: f32[1,2048], index: 0, kind: input, shape index: {}]   ;;  %s139_s1 = inlined_call_operand.hbm [shape: f32[1,2048], index: 1, kind: output, shape index: {}]  }
   0x1   :  { %7 = vsyncpa [#allocation4], 0  ;;  %s102_s6 = smov [#allocation2]   ;;  %s54_s10 = scalar_lea.hbm %s138_s0, 256 }
   0x2   :  { %s14_s7 = sshll.u32 %s102_s6, 4  ;;  %p55_p0 = scmp.ne.s32.totalorder %s138_s0, %s54_s10  ;;  %s15_s7 = int_to_ptr.vmem [resolvable:$true] %s14_s7 }
   0x3   :  { %p58_p1 = scmp.lt.u32.totalorder %s54_s10, %s138_s0 }
   0x5   :  { %p60_p2 = pnand %p58_p1, %p55_p0 }
   0x7   :  { %63 = shalt.err (!%p60_p2)
}
   0x8   :  { %s64_s15 = scalar_lea.vmem %s15_s7, 256  ;;  %p69_p4 = scmp.lt.s32.totalorder %s15_s7, %s15_s7 }
   0x9   :  { %p65_p3 = scmp.ne.s32.totalorder %s15_s7, %s64_s15  ;;  %p70_p5 = scmp.lt.s32.totalorder %s64_s15, %s64_s15 }
   0xb   :  { %p71_p6 = por %p70_p5, %p69_p4 }
   0xd   :  { %p72_p7 = pnand %p71_p6, %p65_p3 }
   0xf   :  { %75 = shalt.err (!%p72_p7)
}
  0x10   :  { %17 = dma.hbm_to_vmem [thread:$0]  %s138_s0, 256, %s15_s7, [#allocation3]  }
  0x11   :  { %98 = dma.done.wait [#allocation3], 256  }
  0x12   :  { %99 = vsyncadd [#allocation3], 4294967040  ;;  %v21_v0 = vld [vmem:[#allocation2] sm:$0xff]  ;;  %v22_v1 = vld [vmem:[#allocation2 + $0x8] sm:$0xff]  ;;  %s103_s18 = smov [#allocation5]  }
  0x13   :  { %v23_v2 = vmul.f32 0.5, %v21_v0  ;;  %v24_v3 = vmul.f32 0.5, %v22_v1  ;;  %s39_s19 = sshll.u32 %s103_s18, 4  ;;  %s40_s19 = int_to_ptr.vmem [resolvable:$true] %s39_s19 }
  0x14   :  { %s76_s0 = scalar_lea.vmem %s40_s19, 256  ;;  %p81_p9 = scmp.lt.s32.totalorder %s40_s19, %s40_s19 }
  0x15   :  { %50 = vtanh.f32 %v23_v2  ;;  %p77_p8 = scmp.ne.s32.totalorder %s40_s19, %s76_s0  ;;  %p82_p10 = scmp.lt.s32.totalorder %s76_s0, %s76_s0 }
  0x16   :  { %52 = vtanh.f32 %v24_v3 }
  0x17   :  { %p83_p11 = por %p82_p10, %p81_p9 }
  0x19   :  { %p84_p12 = pnand %p83_p11, %p77_p8 }
  0x1f   :  { %v51_v4 = vpop.eup %50 }
  0x20   :  { %v53_v5 = vpop.eup %52  ;;  %v27_v6 = vadd.f32 1.0, %v51_v4 }
  0x21   :  { %v28_v7 = vadd.f32 1.0, %v53_v5 }
  0x22   :  { %v29_v8 = vmul.f32 0.5, %v27_v6 }
  0x23   :  { %v30_v9 = vmul.f32 0.5, %v28_v7 }
  0x24   :  { %31 = vst [vmem:[#allocation5] sm:$0xff] %v29_v8 }
  0x25   :  { %32 = vst [vmem:[#allocation5 + $0x8] sm:$0xff] %v30_v9 }
  0x26   :  { %87 = shalt.err (!%p84_p12)
}
  0x27   :  { %s88_s22 = scalar_lea.hbm %s139_s1, 256 }
  0x28   :  { %p89_p13 = scmp.ne.s32.totalorder %s139_s1, %s88_s22  ;;  %p92_p0 = scmp.lt.u32.totalorder %s88_s22, %s139_s1 }
  0x2a   :  { %p94_p1 = pnand %p92_p0, %p89_p13 }
  0x2c   :  { %97 = shalt.err (!%p94_p1)
}
  0x2d   :  { %42 = dma.vmem_to_hbm [thread:$0]  %s40_s19, 256, %s139_s1, [#allocation4]  }
  0x2e   :  { %100 = dma.done.wait [#allocation4], 256  }
  0x2f   :  { %101 = vsyncadd [#allocation4], 4294967040 }
  0x30   :  { %46 = vsyncpa [#allocation3], 1 }
  0x31   :  { %47 = vsyncpa [#allocation4], 1 }

</bundles_post_ra>
